<compile_context>
chip_gen: v7x
topology: tpu7x:2x2x1
jax: 0.10.0
libtpu: 0.0.40
codegen_flags: <defaults>
</compile_context>

<pallas_src>
import functools

import jax
import jax.numpy as jnp
from jax.experimental import pallas as pl
from jax.experimental.pallas import tpu as pltpu

H1, H2 = 64, 32   # hidden dims of the MLP
LANE = 128        # TPU lane width (f32 minor-dim padding unit in VMEM)


def _round_up(n, m):
    return ((n + m - 1) // m) * m


def _mlp_kernel(x_ref, w1_ref, b1_ref, w2_ref, b2_ref, w3_ref, b3_ref, o_ref):
    """One batch tile, computed transposed so the scores land lane-dense.

    Shapes: x_ref (tile_b, D) f32; w1_ref (H1, D) bf16; b1_ref (H1, 1) f32;
    w2_ref (H2, H1) bf16; b2_ref (H2, 1) f32; w3_ref (H2, 1) f32; b3_ref (1, 1) f32;
    o_ref (1, tile_b) f32.
    """
    xb = x_ref[...].astype(jnp.bfloat16)                        # (tile_b, D)

    # Layer 1: h1^T = W1 . x^T   (NT dot_general, same pattern as q.k^T in flash attn)
    h1t = jax.lax.dot_general(
        w1_ref[...], xb, (((1,), (1,)), ((), ())),
        preferred_element_type=jnp.float32)                     # (H1, tile_b)
    h1t = jnp.maximum(h1t + b1_ref[...], 0.0)

    # Layer 2: h2^T = W2 . h1^T
    h2t = jnp.dot(w2_ref[...], h1t.astype(jnp.bfloat16),
                  preferred_element_type=jnp.float32)           # (H2, tile_b)
    h2t = jnp.maximum(h2t + b2_ref[...], 0.0)

    # Layer 3 (single output unit): VPU multiply + XLU sublane reduce -> (1, tile_b).
    o_ref[...] = jnp.sum(h2t * w3_ref[...], axis=0, keepdims=True) + b3_ref[...]


@functools.partial(jax.jit, static_argnames=("tile_b",))
def weighted_ranknet_forward(x, params, tile_b=4096):
    """Run the 3-layer MLP as a batch-gridded Pallas kernel.

    x: (B, input_dim) float32. params in torch layouts. Returns (B, 1) float32.
    """
    w1, b1, w2, b2, w3, b3 = params
    B, D = x.shape

    # ---- batch tile selection (lane-padding aware) ---------------------------
    d_lanes = _round_up(D, LANE)            # VMEM pads the minor dim to 128 lanes
    # ~10 MiB budget for the double-buffered f32 x tiles; weights (<0.3 MiB) and
    # f32 intermediates (~2.5 MiB at tile_b=4096, D<=128) ride on top, keeping
    # total VMEM well under v5e's 16 MiB scoped default and v7x's 64 MiB physical.
    x_budget = 10 << 20
    max_rows = max(LANE, ((x_budget // (2 * 4 * d_lanes)) // LANE) * LANE)
    # Keep >= 2 grid tiles when the batch allows it, so the "parallel" batch axis
    # actually feeds both v7x TensorCores.
    two_tile_cap = _round_up(max(pl.cdiv(B, 2), 1), LANE)
    tile_b = max(LANE, min(tile_b, max_rows, two_tile_cap))
    tile_b = _round_up(tile_b, LANE)        # multiple of 128 -> lane-dense out tile

    b_pad = _round_up(B, tile_b)
    if b_pad != B:
        x = jnp.pad(x, ((0, b_pad - B), (0, 0)))
    num_tiles = b_pad // tile_b

    # ---- parameter layouts for the transposed pipeline -----------------------
    w1_bf = w1.astype(jnp.bfloat16)                       # (H1, D)   torch layout
    w2_bf = w2.astype(jnp.bfloat16)                       # (H2, H1)  torch layout
    b1_c = b1.reshape(H1, 1).astype(jnp.float32)
    b2_c = b2.reshape(H2, 1).astype(jnp.float32)
    w3_c = w3.reshape(H2, 1).astype(jnp.float32)          # (H2, 1) column
    b3_c = b3.reshape(1, 1).astype(jnp.float32)

    grid_spec = pltpu.PrefetchScalarGridSpec(
        num_scalar_prefetch=0,
        grid=(num_tiles,),
        in_specs=[
            # x streams in batch tiles (auto double-buffered HBM->VMEM).
            pl.BlockSpec((tile_b, D), lambda i: (i, 0)),
            # Weights / biases: whole-array blocks, constant index_map ->
            # fetched once, resident in VMEM for the whole grid.
            pl.BlockSpec((H1, D), lambda i: (0, 0)),
            pl.BlockSpec((H1, 1), lambda i: (0, 0)),
            pl.BlockSpec((H2, H1), lambda i: (0, 0)),
            pl.BlockSpec((H2, 1), lambda i: (0, 0)),
            pl.BlockSpec((H2, 1), lambda i: (0, 0)),
            pl.BlockSpec((1, 1), lambda i: (0, 0)),
        ],
        # Lane-dense output: one (1, tile_b) row per grid step into a (1, B_pad) array.
        out_specs=pl.BlockSpec((1, tile_b), lambda i: (0, i)),
    )

    flops = 2 * b_pad * (D * H1 + H1 * H2 + H2)
    bytes_accessed = (4 * b_pad * (D + 1)           # x in (f32) + scores out
                      + 2 * (H1 * D + H2 * H1)      # bf16 weights
                      + 4 * (H1 + H2 + H2 + 1))     # f32 biases + w3 column

    out = pl.pallas_call(
        _mlp_kernel,
        out_shape=jax.ShapeDtypeStruct((1, b_pad), jnp.float32),
        grid_spec=grid_spec,
        compiler_params=pltpu.CompilerParams(
            # Batch tiles are independent -> megacore sharding on v7x.
            dimension_semantics=("parallel",),
            # Explicit scoped-VMEM cap (safe on all generations, >> actual use).
            vmem_limit_bytes=32 * 1024 * 1024,
        ),
        cost_estimate=pl.CostEstimate(
            flops=flops, transcendentals=0, bytes_accessed=bytes_accessed),
    )(x, w1_bf, b1_c, w2_bf, b2_c, w3_c, b3_c)

    # (1, B_pad) -> (B, 1), dropping the padded rows.
    return out.reshape(b_pad, 1)[:B]


def init_params(key, input_dim):
    """Deterministic init mimicking torch.nn.Linear (U(+/- 1/sqrt(fan_in))), torch layouts."""
    def linear_init(k, fan_in, fan_out):
        kw, kb = jax.random.split(k)
        bound = 1.0 / (fan_in ** 0.5)
        w = jax.random.uniform(kw, (fan_out, fan_in), jnp.float32, -bound, bound)
        b = jax.random.uniform(kb, (fan_out,), jnp.float32, -bound, bound)
        return w, b

    k1, k2, k3 = jax.random.split(key, 3)
    w1, b1 = linear_init(k1, input_dim, H1)     # (64, D), (64,)
    w2, b2 = linear_init(k2, H1, H2)            # (32, 64), (32,)
    w3, b3 = linear_init(k3, H2, 1)             # (1, 32), (1,)
    return (w1, b1, w2, b2, w3, b3)


if __name__ == "__main__":
    key = jax.random.PRNGKey(0)
    k_params, k_x1, k_x2 = jax.random.split(key, 3)

    input_dim = 32
    params = init_params(k_params, input_dim)
    w1, b1, w2, b2, w3, b3 = params

    def reference(x):
        h = jnp.maximum(x @ w1.T + b1, 0.0)
        h = jnp.maximum(h @ w2.T + b2, 0.0)
        return h @ w3.T + b3

    # Small single-tile case (typical usage of the module).
    x_small = jax.random.normal(k_x1, (16, input_dim), jnp.float32)
    out_small = jax.block_until_ready(weighted_ranknet_forward(x_small, params))
    assert out_small.shape == (16, 1)
    # bf16 MXU operands (same as TPU DEFAULT precision) -> relaxed tolerance.
    assert jnp.allclose(out_small, reference(x_small), atol=2e-2, rtol=2e-2)

    # Ragged multi-tile case: exercises batch tiling, tail padding, and the
    # >=2-tile split used for v7x megacore.
    x_big = jax.random.normal(k_x2, (1037, input_dim), jnp.float32)
    out_big = jax.block_until_ready(weighted_ranknet_forward(x_big, params))
    assert out_big.shape == (1037, 1)
    assert jnp.allclose(out_big, reference(x_big), atol=2e-2, rtol=2e-2)

    print("KERNEL_OK")
</pallas_src>

<mosaic_0001>
module attributes {stable_mosaic.version = 11 : i64} {
  func.func @_mlp_kernel(%arg0: i32, %arg1: memref<128x32xf32, #tpu.memory_space<vmem>>, %arg2: memref<64x32xbf16, #tpu.memory_space<vmem>>, %arg3: memref<64x1xf32, #tpu.memory_space<vmem>>, %arg4: memref<32x64xbf16, #tpu.memory_space<vmem>>, %arg5: memref<32x1xf32, #tpu.memory_space<vmem>>, %arg6: memref<32x1xf32, #tpu.memory_space<vmem>>, %arg7: memref<1x1xf32, #tpu.memory_space<vmem>>, %arg8: memref<1x128xf32, #tpu.memory_space<vmem>>) attributes {dimension_semantics = [#tpu.dimension_semantics<parallel>], iteration_bounds = array<i64: 1>, scalar_prefetch = 0 : i64, scratch_operands = 0 : i64, tpu.core_type = #tpu.core_type<tc>, window_params = [{transform_indices = @transform_0, window_bounds = array<i64: 128, 32>}, {pipeline_mode = #tpu.pipeline_mode<synchronous>, transform_indices = @transform_1, window_bounds = array<i64: 64, 32>}, {pipeline_mode = #tpu.pipeline_mode<synchronous>, transform_indices = @transform_2, window_bounds = array<i64: 64, 1>}, {pipeline_mode = #tpu.pipeline_mode<synchronous>, transform_indices = @transform_3, window_bounds = array<i64: 32, 64>}, {pipeline_mode = #tpu.pipeline_mode<synchronous>, transform_indices = @transform_4, window_bounds = array<i64: 32, 1>}, {pipeline_mode = #tpu.pipeline_mode<synchronous>, transform_indices = @transform_5, window_bounds = array<i64: 32, 1>}, {pipeline_mode = #tpu.pipeline_mode<synchronous>, transform_indices = @transform_6, window_bounds = array<i64: 1, 1>}, {transform_indices = @transform_7, window_bounds = array<i64: 1, 128>}]} {
    %c0 = arith.constant 0 : index
    %c0_0 = arith.constant 0 : index
    %0 = vector.load %arg1[%c0, %c0_0] : memref<128x32xf32, #tpu.memory_space<vmem>>, vector<128x32xf32>
    %1 = arith.truncf %0 : vector<128x32xf32> to vector<128x32xbf16>
    %c0_1 = arith.constant 0 : index
    %c0_2 = arith.constant 0 : index
    %2 = vector.load %arg2[%c0_1, %c0_2] : memref<64x32xbf16, #tpu.memory_space<vmem>>, vector<64x32xbf16>
    %cst = arith.constant dense<0.000000e+00> : vector<64x128xf32>
    %3 = tpu.matmul %2, %1, %cst {dimension_numbers = #tpu.dot_dimension_numbers<[1], [1], [0], [0], [0, 0, 1, 0], [], []>} : vector<64x32xbf16>, vector<128x32xbf16>, vector<64x128xf32> -> vector<64x128xf32>
    %c0_3 = arith.constant 0 : index
    %c0_4 = arith.constant 0 : index
    %4 = vector.load %arg3[%c0_3, %c0_4] : memref<64x1xf32, #tpu.memory_space<vmem>>, vector<64x1xf32>
    %5 = vector.broadcast %4 : vector<64x1xf32> to vector<64x128xf32>
    %6 = arith.addf %3, %5 : vector<64x128xf32>
    %cst_5 = arith.constant 0.000000e+00 : f32
    %7 = vector.broadcast %cst_5 : f32 to vector<64x128xf32>
    %8 = arith.maximumf %6, %7 : vector<64x128xf32>
    %c0_6 = arith.constant 0 : index
    %c0_7 = arith.constant 0 : index
    %9 = vector.load %arg4[%c0_6, %c0_7] : memref<32x64xbf16, #tpu.memory_space<vmem>>, vector<32x64xbf16>
    %10 = arith.truncf %8 : vector<64x128xf32> to vector<64x128xbf16>
    %cst_8 = arith.constant dense<0.000000e+00> : vector<32x128xf32>
    %11 = tpu.matmul %9, %10, %cst_8 {dimension_numbers = #tpu.dot_dimension_numbers<[1], [0], [0], [1], [0, 0, 1, 1], [], []>} : vector<32x64xbf16>, vector<64x128xbf16>, vector<32x128xf32> -> vector<32x128xf32>
    %c0_9 = arith.constant 0 : index
    %c0_10 = arith.constant 0 : index
    %12 = vector.load %arg5[%c0_9, %c0_10] : memref<32x1xf32, #tpu.memory_space<vmem>>, vector<32x1xf32>
    %13 = vector.broadcast %12 : vector<32x1xf32> to vector<32x128xf32>
    %14 = arith.addf %11, %13 : vector<32x128xf32>
    %cst_11 = arith.constant 0.000000e+00 : f32
    %15 = vector.broadcast %cst_11 : f32 to vector<32x128xf32>
    %16 = arith.maximumf %14, %15 : vector<32x128xf32>
    %c0_12 = arith.constant 0 : index
    %c0_13 = arith.constant 0 : index
    %17 = vector.load %arg6[%c0_12, %c0_13] : memref<32x1xf32, #tpu.memory_space<vmem>>, vector<32x1xf32>
    %18 = vector.broadcast %17 : vector<32x1xf32> to vector<32x128xf32>
    %19 = arith.mulf %16, %18 : vector<32x128xf32>
    %cst_14 = arith.constant dense<0.000000e+00> : vector<128xf32>
    %20 = vector.multi_reduction <add>, %19, %cst_14 [0] : vector<32x128xf32> to vector<128xf32>
    %21 = vector.shape_cast %20 : vector<128xf32> to vector<1x128xf32>
    %c0_15 = arith.constant 0 : index
    %c0_16 = arith.constant 0 : index
    %22 = vector.load %arg7[%c0_15, %c0_16] : memref<1x1xf32, #tpu.memory_space<vmem>>, vector<1x1xf32>
    %23 = vector.broadcast %22 : vector<1x1xf32> to vector<1x128xf32>
    %24 = arith.addf %21, %23 : vector<1x128xf32>
    %c0_17 = arith.constant 0 : index
    %c0_18 = arith.constant 0 : index
    %25 = vector.load %arg8[%c0_17, %c0_18] : memref<1x128xf32, #tpu.memory_space<vmem>>, vector<1x128xf32>
    tpu.vector_store %arg8[%c0_17, %c0_18], %24 {strides = array<i32>} : memref<1x128xf32, #tpu.memory_space<vmem>>, vector<1x128xf32>,
    return
  }
  func.func @transform_0(%arg0: i32) -> (i32, i32) {
    %c0_i32 = arith.constant 0 : i32
    %c0_i32_0 = arith.constant 0 : i32
    return %arg0, %c0_i32 : i32, i32
  }
  func.func @transform_1(%arg0: i32) -> (i32, i32) {
    %c0_i32 = arith.constant 0 : i32
    %c0_i32_0 = arith.constant 0 : i32
    %c0_i32_1 = arith.constant 0 : i32
    return %c0_i32, %c0_i32_0 : i32, i32
  }
  func.func @transform_2(%arg0: i32) -> (i32, i32) {
    %c0_i32 = arith.constant 0 : i32
    %c0_i32_0 = arith.constant 0 : i32
    %c0_i32_1 = arith.constant 0 : i32
    return %c0_i32, %c0_i32_0 : i32, i32
  }
  func.func @transform_3(%arg0: i32) -> (i32, i32) {
    %c0_i32 = arith.constant 0 : i32
    %c0_i32_0 = arith.constant 0 : i32
    %c0_i32_1 = arith.constant 0 : i32
    return %c0_i32, %c0_i32_0 : i32, i32
  }
  func.func @transform_4(%arg0: i32) -> (i32, i32) {
    %c0_i32 = arith.constant 0 : i32
    %c0_i32_0 = arith.constant 0 : i32
    %c0_i32_1 = arith.constant 0 : i32
    return %c0_i32, %c0_i32_0 : i32, i32
  }
  func.func @transform_5(%arg0: i32) -> (i32, i32) {
    %c0_i32 = arith.constant 0 : i32
    %c0_i32_0 = arith.constant 0 : i32
    %c0_i32_1 = arith.constant 0 : i32
    return %c0_i32, %c0_i32_0 : i32, i32
  }
  func.func @transform_6(%arg0: i32) -> (i32, i32) {
    %c0_i32 = arith.constant 0 : i32
    %c0_i32_0 = arith.constant 0 : i32
    %c0_i32_1 = arith.constant 0 : i32
    return %c0_i32, %c0_i32_0 : i32, i32
  }
  func.func @transform_7(%arg0: i32) -> (i32, i32) {
    %c0_i32 = arith.constant 0 : i32
    %c0_i32_0 = arith.constant 0 : i32
    return %c0_i32, %arg0 : i32, i32
  }
}

</mosaic_0001>

<bundles_post_ra>
// kernel: weighted_ranknet_forward.1
= control target key start
LH: loop header
LB: loop body
LE: loop exit
PB: predicated region body
PF: predicated region fallthrough
CT: control target
= control target key end

     0   :  { %vm129_vm0 = vcmask 261120   ;;  %v477_v3 = vmov 0   ;;  %vm281_vm1 = vcmask 523264   ;;  %s660_s0 = inlined_call_operand.vmem [shape: f32[128,32], index: 0, kind: input, shape index: {}]   ;;  %s661_s6 = inlined_call_operand.<no memory space> [shape: f32[1,1], index: 6, kind: input, shape index: {}]   ;;  %s662_s1 = inlined_call_operand.vmem [shape: bf16[64,32], index: 1, kind: input, shape index: {}]   ;;  %s663_s2 = inlined_call_operand.vmem [shape: f32[64,1], index: 2, kind: input, shape index: {}]   ;;  %s664_s4 = inlined_call_operand.vmem [shape: f32[32,1], index: 4, kind: input, shape index: {}]   ;;  %s665_s5 = inlined_call_operand.vmem [shape: f32[32,1], index: 5, kind: input, shape index: {}]   ;;  %s666_s3 = inlined_call_operand.vmem [shape: bf16[32,64], index: 3, kind: input, shape index: {}]   ;;  %s667_s7 = inlined_call_operand.vmem [shape: f32[1,128], index: 7, kind: output, shape index: {}]  }
   0x1   :  { %v29_v0 = vld [vmem:[%s660_s0] sm:$0xff]  ;;  %v30_v1 = vld [vmem:[%s660_s0 + $0x8] sm:$0xff]  ;;  %v31_v2 = vld [vmem:[%s660_s0 + $0x10] sm:$0xff]  ;;  %469 = vset.pattern.permute.xlu0 %v477_v3  ;;  %470 = vset.pattern.permute.xlu1 %v477_v3  ;;  %v12_v4 = vstv %s661_s6 }
   0x2   :  { %v45_v5 = vpack.c.bf16 %v30_v1, %v29_v0  ;;  %v32_v6 = vld [vmem:[%s660_s0 + $0x18] sm:$0xff]  ;;  %13 = vst [vmem:[#allocation2] sm:$0x1] %v12_v4  ;;  %v33_v9 = vld [vmem:[%s660_s0 + $0x20] sm:$0xff]  ;;  %v34_v10 = vld [vmem:[%s660_s0 + $0x28] sm:$0xff] }
   0x3   :  { %v46_v7 = vpack.c.bf16 %v32_v6, %v31_v2  ;;  %v471_v11 = vld [vmem:[%s662_s1] sm:$0xff]   ;;  %v47_v13 = vpack.c.bf16 %v34_v10, %v33_v9  ;;  %v63_v15 = vld [vmem:[%s663_s2 + $0x10] sm:$0xff]  ;;  %v62_v16 = vld [vmem:[%s663_s2 + $0x8] sm:$0xff] }
   0x4   :  { %460 = vmatprep.subr.msk.bf16.mxu0 %vm129_vm0, %v45_v5  ;;  %v143_v8 = vsel %vm129_vm0, %v45_v5, 0  ;;  %440 = vmatprep.mubr.msk.bf16.mxu0 %vm129_vm0, %v471_v11  ;;  %v61_v14 = vld [vmem:[%s663_s2] sm:$0xff]  ;;  %v64_v17 = vld [vmem:[%s663_s2 + $0x18] sm:$0xff]  ;;  %v35_v18 = vld [vmem:[%s660_s0 + $0x30] sm:$0xff] }
   0x5   :  { %425 = vmatpush3.bf16.xpose.msra.mxu0 %v143_v8  ;;  %v146_v12 = vsel %vm129_vm0, %v46_v7, 0  ;;  %71 = vperm.xlu0 %469, %v61_v14   ;;  %v36_v19 = vld [vmem:[%s660_s0 + $0x38] sm:$0xff]  ;;  %v65_v20 = vld [vmem:[%s663_s2 + $0x20] sm:$0xff]  ;;  %v66_v21 = vld [vmem:[%s663_s2 + $0x28] sm:$0xff]  ;;  %v149_v22 = vsel %vm129_vm0, %v47_v13, 0 }
   0x6   :  { %461 = vmatprep.subr.msk.bf16.mxu0 %vm129_vm0, %v46_v7  ;;  %81 = vperm.xlu1 %470, %v63_v15   ;;  %v48_v23 = vpack.c.bf16 %v36_v19, %v35_v18  ;;  %v67_v24 = vld [vmem:[%s663_s2 + $0x30] sm:$0xff]  ;;  %v68_v25 = vld [vmem:[%s663_s2 + $0x38] sm:$0xff]  ;;  %v37_v26 = vld [vmem:[%s660_s0 + $0x40] sm:$0xff] }
   0x7   :  { %v38_v27 = vld [vmem:[%s660_s0 + $0x48] sm:$0xff]  ;;  %v247_v28 = vld [vmem:[%s664_s4] sm:$0xff]  ;;  %v249_v32 = vld [vmem:[%s664_s4 + $0x10] sm:$0xff] }
   0x8   :  { %v248_v29 = vld [vmem:[%s664_s4 + $0x8] sm:$0xff]  ;;  %v152_v30 = vsel %vm129_vm0, %v48_v23, 0  ;;  %v49_v31 = vpack.c.bf16 %v38_v27, %v37_v26  ;;  %v250_v33 = vld [vmem:[%s664_s4 + $0x18] sm:$0xff]  ;;  %v39_v34 = vld [vmem:[%s660_s0 + $0x50] sm:$0xff] }
   0x9   :  { %76 = vperm.xlu0 %469, %v62_v16   ;;  %v40_v35 = vld [vmem:[%s660_s0 + $0x58] sm:$0xff]  ;;  %v341_v36 = vld [vmem:[%s665_s5] sm:$0xff]  ;;  %v342_v37 = vld [vmem:[%s665_s5 + $0x8] sm:$0xff] }
   0xa   :  { %86 = vperm.xlu1 %470, %v64_v17   ;;  %v155_v38 = vsel %vm129_vm0, %v49_v31, 0  ;;  %v50_v39 = vpack.c.bf16 %v40_v35, %v39_v34  ;;  %v343_v40 = vld [vmem:[%s665_s5 + $0x10] sm:$0xff]  ;;  %v344_v41 = vld [vmem:[%s665_s5 + $0x18] sm:$0xff]  ;;  %v41_v42 = vld [vmem:[%s660_s0 + $0x60] sm:$0xff] }
   0xb   :  { %v42_v43 = vld [vmem:[%s660_s0 + $0x68] sm:$0xff]  ;;  %v378_v44 = vld [vmem:[#allocation2] sm:$0x1]  ;;  %v43_v47 = vld [vmem:[%s660_s0 + $0x70] sm:$0xff] }
   0xc   :  { %v158_v45 = vsel %vm129_vm0, %v50_v39, 0  ;;  %v51_v46 = vpack.c.bf16 %v42_v43, %v41_v42  ;;  %v44_v48 = vld [vmem:[%s660_s0 + $0x78] sm:$0xff]  ;;  %v472_v52 = vld [vmem:[%s662_s1 + $0x8] sm:$0xff]   ;;  %v473_v53 = vld [vmem:[%s662_s1 + $0x10] sm:$0xff]  }
   0xd   :  { %427 = vmatpush3.bf16.xpose.msra.mxu0 %v146_v12  ;;  %91 = vperm.xlu0 %469, %v65_v20   ;;  %v52_v50 = vpack.c.bf16 %v44_v48, %v43_v47  ;;  %v474_v54 = vld [vmem:[%s662_s1 + $0x18] sm:$0xff]   ;;  %v475_v55 = vld [vmem:[%s666_s3] sm:$0xff]  }
   0xe   :  { %462 = vmatprep.subr.msk.bf16.mxu0 %vm129_vm0, %v47_v13  ;;  %96 = vperm.xlu1 %470, %v66_v21   ;;  %v161_v49 = vsel %vm129_vm0, %v51_v46, 0 }
   0xf   :  { %v164_v51 = vsel %vm129_vm0, %v52_v50, 0  ;;  %456 = vmatprep.mubr.msk.bf16.mxu1 %vm281_vm1, %v475_v55  ;;  %v384_v55 = vlaneseq }
  0x11   :  { %101 = vperm.xlu0 %469, %v67_v24  }
  0x12   :  { %106 = vperm.xlu1 %470, %v68_v25  }
  0x15   :  { %429 = vmatpush3.bf16.xpose.msra.mxu0 %v149_v22  ;;  %253 = vperm.xlu0 %469, %v247_v28   ;;  %v476_v28 = vld [vmem:[%s666_s3 + $0x8] sm:$0xff]  }
  0x16   :  { %463 = vmatprep.subr.msk.bf16.mxu0 %vm129_vm0, %v48_v23  ;;  %258 = vperm.xlu1 %470, %v248_v29  }
  0x19   :  { %263 = vperm.xlu0 %469, %v249_v32  }
  0x1a   :  { %268 = vperm.xlu1 %470, %v250_v33  }
  0x1d   :  { %431 = vmatpush3.bf16.xpose.msra.mxu0 %v152_v30  ;;  %347 = vperm.xlu0 %469, %v341_v36  }
  0x1e   :  { %464 = vmatprep.subr.msk.bf16.mxu0 %vm129_vm0, %v49_v31  ;;  %352 = vperm.xlu1 %470, %v342_v37  }
  0x21   :  { %357 = vperm.xlu0 %469, %v343_v40  }
  0x22   :  { %362 = vperm.xlu1 %470, %v344_v41  }
  0x25   :  { %433 = vmatpush3.bf16.xpose.msra.mxu0 %v155_v38  ;;  %381 = vperm.xlu0 %469, %v378_v44  }
  0x26   :  { %465 = vmatprep.subr.msk.bf16.mxu0 %vm129_vm0, %v50_v39 }
  0x2d   :  { %435 = vmatpush3.bf16.xpose.msra.mxu0 %v158_v45 }
  0x2e   :  { %466 = vmatprep.subr.msk.bf16.mxu0 %vm129_vm0, %v51_v46 }
  0x35   :  { %437 = vmatpush3.bf16.xpose.msra.mxu0 %v161_v49 }
  0x36   :  { %467 = vmatprep.subr.msk.bf16.mxu0 %vm129_vm0, %v52_v50 }
  0x3d   :  { %439 = vmatpush3.bf16.xpose.msra.mxu0 %v164_v51 }
  0x44   :  { %441 = vmatmul.mubr.msk.bf16.vlgmr.msra.gmra.mrb[0].mxu0 %vm129_vm0, %v472_v52 }
  0x45   :  { %444 = vmatprep.mubr.msk.bf16.mxu0 %vm129_vm0, %v473_v53 }
  0x4c   :  { %445 = vmatmul.mubr.msk.bf16.gmra.mrb[4].mxu0 %vm129_vm0, %v474_v54 }
  0x84   :  { %v72_v56 = vpop.permute.xlu0 %71 }
  0x85   :  { %v82_v57 = vpop.permute.xlu1 %81 }
  0x88   :  { %v77_v58 = vpop.permute.xlu0 %76 }
  0x89   :  { %v87_v59 = vpop.permute.xlu1 %86 }
  0x8c   :  { %v92_v63 = vpop.permute.xlu0 %91 }
  0x8d   :  { %v97_v4 = vpop.permute.xlu1 %96 }
  0x90   :  { %v102_v11 = vpop.permute.xlu0 %101 }
  0x91   :  { %v107_v16 = vpop.permute.xlu1 %106 }
  0x94   :  { %v254_v29 = vpop.permute.xlu0 %253 }
  0x95   :  { %v259_v30 = vpop.permute.xlu1 %258 }
  0x98   :  { %v264_v31 = vpop.permute.xlu0 %263 }
  0x99   :  { %v269_v32 = vpop.permute.xlu1 %268 }
  0x9c   :  { %v348_v38 = vpop.permute.xlu0 %347 }
  0x9d   :  { %v353_v43 = vpop.permute.xlu1 %352 }
  0xa0   :  { %v358_v49 = vpop.permute.xlu0 %357 }
  0xa1   :  { %v363_v52 = vpop.permute.xlu1 %362 }
 0x117   :  { %v442_v60 = vpop.f32.mrb[0].mxu0 }
 0x118   :  { %v209_v61 = vadd.f32 %v442_v60, %v82_v57  ;;  %v200_v62 = vpop.f32.mrb[1].mxu0 }
 0x119   :  { %v201_v0 = vadd.f32 %v200_v62, %v72_v56  ;;  %v443_v1 = vpop.f32.mrb[2].mxu0 }
 0x11a   :  { %v212_v2 = vadd.f32 %v443_v1, %v87_v59  ;;  %v203_v3 = vpop.f32.mrb[3].mxu0  ;;  %v233_v6 = vmax.f32 %v209_v61, 0.0 }
 0x11b   :  { %v204_v5 = vadd.f32 %v203_v3, %v77_v58  ;;  %v231_v8 = vmax.f32 %v201_v0, 0.0  ;;  %v385_v58 = vshrl.u32 %v384_v55, 7 }
 0x11c   :  { %v234_v7 = vmax.f32 %v212_v2, 0.0 }
 0x11d   :  { %v232_v9 = vmax.f32 %v204_v5, 0.0  ;;  %v386_v61 = vsub.s32 0, %v385_v58 }
 0x11e   :  { %v244_v10 = vpack.c.bf16 %v234_v7, %v233_v6 }
 0x11f   :  { %v446_v12 = vpop.f32.mrb[4].mxu0  ;;  %v243_v13 = vpack.c.bf16 %v232_v9, %v231_v8 }
 0x120   :  { %v225_v14 = vadd.f32 %v446_v12, %v102_v11  ;;  %v216_v15 = vpop.f32.mrb[5].mxu0 }
 0x121   :  { %v217_v17 = vadd.f32 %v216_v15, %v92_v63  ;;  %v447_v18 = vpop.f32.mrb[6].mxu0  ;;  %448 = vmatprep.subr.bf16.mxu1 %v243_v13  ;;  %v382_v63 = vpop.permute.xlu0 %381 }
 0x122   :  { %v228_v19 = vadd.f32 %v447_v18, %v107_v16  ;;  %v219_v20 = vpop.f32.mrb[7].mxu0  ;;  %449 = vmatpush3.bf16.msra.mxu1 %v243_v13  ;;  %v237_v22 = vmax.f32 %v225_v14, 0.0  ;;  %v387_v1 = vrot.slane %v382_v63, %v386_v61 }
 0x123   :  { %v220_v21 = vadd.f32 %v219_v20, %v97_v4  ;;  %450 = vmatprep.subr.bf16.mxu1 %v244_v10  ;;  %v235_v24 = vmax.f32 %v217_v17, 0.0 }
 0x124   :  { %v238_v23 = vmax.f32 %v228_v19, 0.0 }
 0x125   :  { %v236_v25 = vmax.f32 %v220_v21, 0.0 }
 0x126   :  { %v246_v26 = vpack.c.bf16 %v238_v23, %v237_v22  ;;  %451 = vmatpush3.bf16.msra.mxu1 %v244_v10 }
 0x127   :  { %v245_v27 = vpack.c.bf16 %v236_v25, %v235_v24 }
 0x129   :  { %452 = vmatprep.subr.bf16.mxu1 %v245_v27 }
 0x12a   :  { %453 = vmatpush3.bf16.msra.mxu1 %v245_v27 }
 0x12b   :  { %454 = vmatprep.subr.bf16.mxu1 %v246_v26 }
 0x12e   :  { %455 = vmatpush3.bf16.msra.mxu1 %v246_v26 }
 0x131   :  { %457 = vmatmul.mubr.msk.bf16.vlgmr.msra.gmra.mrb[0].mxu1 %vm281_vm1, %v476_v28 }
 0x204   :  { %v458_v33 = vpop.f32.mrb[0].mxu1 }
 0x205   :  { %v322_v34 = vpop.f32.mrb[1].mxu1  ;;  %v331_v35 = vadd.f32 %v458_v33, %v264_v31 }
 0x206   :  { %v323_v36 = vadd.f32 %v322_v34, %v254_v29  ;;  %v459_v37 = vpop.f32.mrb[2].mxu1 }
 0x207   :  { %v325_v39 = vpop.f32.mrb[3].mxu1  ;;  %v334_v41 = vadd.f32 %v459_v37, %v269_v32  ;;  %v339_v44 = vmax.f32 %v331_v35, 0.0 }
 0x208   :  { %v337_v40 = vmax.f32 %v323_v36, 0.0  ;;  %v326_v42 = vadd.f32 %v325_v39, %v259_v30 }
 0x209   :  { %v340_v47 = vmax.f32 %v334_v41, 0.0  ;;  %v367_v50 = vmul.f32 %v358_v49, %v339_v44 }
 0x20a   :  { %v338_v45 = vmax.f32 %v326_v42, 0.0  ;;  %v365_v46 = vmul.f32 %v348_v38, %v337_v40 }
 0x20b   :  { %v368_v53 = vmul.f32 %v363_v52, %v340_v47 }
 0x20c   :  { %v366_v48 = vmul.f32 %v353_v43, %v338_v45 }
 0x20e   :  { %v369_v51 = vadd.f32 %v366_v48, %v365_v46 }
 0x210   :  { %v370_v54 = vadd.f32 %v369_v51, %v367_v50 }
 0x212   :  { %v371_v56 = vadd.f32 %v370_v54, %v368_v53 }
 0x214   :  { %v372_v57 = vrot.slane %v371_v56, 4 }
 0x216   :  { %v373_v59 = vadd.f32 %v372_v57, %v371_v56 }
 0x218   :  { %v374_v60 = vrot.slane %v373_v59, 2 }
 0x21a   :  { %v375_v62 = vadd.f32 %v374_v60, %v373_v59 }
 0x21c   :  { %v376_v0 = vrot.slane %v375_v62, 1 }
 0x21e   :  { %v377_v2 = vadd.f32 %v376_v0, %v375_v62 }
 0x220   :  { %v388_v3 = vadd.f32 %v387_v1, %v377_v2 }
 0x222   :  { %389 = vst [vmem:[%s667_s7] sm:$0x1] %v388_v3 }

</bundles_post_ra>
